<compile_context>
chip_gen: v6e
topology: v6e:2x2x1
jax: 0.10.0
libtpu: 0.0.40
codegen_flags: <defaults>
</compile_context>

<pallas_src>
import jax
import jax.numpy as jnp
from jax.experimental import pallas as pl
from jax.experimental.pallas import tpu as pltpu

NEURONS = 256
BN_EPS = 0.8
LRELU_SLOPE = 0.2
WEIGHT_DTYPE = jnp.bfloat16   # MXU-native on v5e/v6e/v7x; elementwise math stays f32.

# Row layout of the packed (8, 256) f32 parameter block.
ROW_G1, ROW_B1, ROW_G2, ROW_B2, ROW_G3, ROW_B3, ROW_W4, ROW_PAD = range(8)


def _bn_lrelu(h, gamma, beta, inv_batch):
    # One-pass batch stats: two independent lane-parallel axis-0 reductions,
    # biased variance via E[h^2] - E[h]^2 (exact PyTorch training-mode BN).
    s1 = jnp.sum(h, axis=0, keepdims=True)
    s2 = jnp.sum(h * h, axis=0, keepdims=True)
    mean = s1 * inv_batch
    var = s2 * inv_batch - mean * mean
    # Folded affine: hn = h*scale + shift (one mul + one add per element).
    scale = gamma * jax.lax.rsqrt(var + BN_EPS)
    shift = beta - mean * scale
    hn = h * scale + shift
    # LeakyReLU(0.2) as a single vmax per vreg.
    return jnp.maximum(hn, LRELU_SLOPE * hn)


def discriminator_kernel(inv_ref, xa_ref, xb_ref, w1_ref, w2_ref, w3_ref,
                         bn_ref, out_ref):
    inv_batch = inv_ref[0, 0]
    half_in = xa_ref.shape[-1]

    # Layer 1: cat([xa, xb], -1) @ W1 as two MXU pushes against static views of
    # the single W1 ref (free slices, one weight DMA), summed in an f32 acc.
    # TODO(synk): on v7x accumulate both pushes in the MRB via
    # pltpu.matmul_push_rhs / matmul_acc_lhs / matmul_pop to drop the VPU add.
    h = jnp.dot(xa_ref[...].astype(WEIGHT_DTYPE), w1_ref[:half_in, :],
                preferred_element_type=jnp.float32)
    h = h + jnp.dot(xb_ref[...].astype(WEIGHT_DTYPE),
                    w1_ref[half_in:2 * half_in, :],
                    preferred_element_type=jnp.float32)
    h = _bn_lrelu(h, bn_ref[ROW_G1:ROW_G1 + 1, :], bn_ref[ROW_B1:ROW_B1 + 1, :],
                  inv_batch)

    h = jnp.dot(h.astype(WEIGHT_DTYPE), w2_ref[...],
                preferred_element_type=jnp.float32)
    h = _bn_lrelu(h, bn_ref[ROW_G2:ROW_G2 + 1, :], bn_ref[ROW_B2:ROW_B2 + 1, :],
                  inv_batch)

    h = jnp.dot(h.astype(WEIGHT_DTYPE), w3_ref[...],
                preferred_element_type=jnp.float32)
    h = _bn_lrelu(h, bn_ref[ROW_G3:ROW_G3 + 1, :], bn_ref[ROW_B3:ROW_B3 + 1, :],
                  inv_batch)

    # Final Linear(256, 1) as a lane reduction (avoids a degenerate N=1 matmul);
    # sigmoid expressed via tanh -> EUP slot, no exp overflow for large |logit|.
    logits = jnp.sum(h * bn_ref[ROW_W4:ROW_W4 + 1, :], axis=-1, keepdims=True)
    out_ref[...] = 0.5 * (jnp.tanh(0.5 * logits) + 1.0)


def make_discriminator_params(num_joints, key):
    """Deterministic synthetic parameters matching the module's shapes."""
    half_in = num_joints * 2                  # features per keypoint tensor
    in_features = half_in * 2                 # image_size * 2
    k1, k2, k3, k4 = jax.random.split(key, 4)

    def lin(k, fan_in, fan_out):
        bound = 1.0 / jnp.sqrt(jnp.float32(fan_in))
        return jax.random.uniform(k, (fan_in, fan_out), jnp.float32, -bound, bound)

    w1 = lin(k1, in_features, NEURONS)        # stored (in, out)
    w2 = lin(k2, NEURONS, NEURONS)
    w3 = lin(k3, NEURONS, NEURONS)
    w4 = lin(k4, NEURONS, 1)                  # (256, 1)

    # Pack BN affines (gamma=1, beta=0 at init) + final-layer row into one
    # (8, 256) f32 block -> single DMA, static row slices in the kernel.
    bn_pack = jnp.zeros((8, NEURONS), jnp.float32)
    bn_pack = bn_pack.at[ROW_G1].set(1.0)
    bn_pack = bn_pack.at[ROW_G2].set(1.0)
    bn_pack = bn_pack.at[ROW_G3].set(1.0)
    bn_pack = bn_pack.at[ROW_W4].set(w4[:, 0])

    return {
        "w1": w1.astype(WEIGHT_DTYPE),
        "w2": w2.astype(WEIGHT_DTYPE),
        "w3": w3.astype(WEIGHT_DTYPE),
        "bn_pack": bn_pack,
        # f32 masters, only used by the fp32 fidelity reference check.
        "w1_f32": w1, "w2_f32": w2, "w3_f32": w3,
    }


def _discriminator_pallas(params, kp_cropped, kp_original):
    """kp_cropped / kp_original: (G, B, F) — G stacked evaluations (e.g. real|fake)."""
    G, B, F = kp_cropped.shape
    inv_batch = jnp.full((1, 1), 1.0 / B, jnp.float32)   # SMEM scalar input

    args = (inv_batch, kp_cropped, kp_original,
            params["w1"], params["w2"], params["w3"], params["bn_pack"])

    flops = 2 * G * B * (2 * F * NEURONS + 2 * NEURONS * NEURONS + NEURONS)
    transcendentals = G * (B + 3 * NEURONS)     # tanh per row + rsqrt per feature
    bytes_accessed = sum(int(a.size) * a.dtype.itemsize for a in args) + G * B * 4

    grid_spec = pltpu.PrefetchScalarGridSpec(
        num_scalar_prefetch=0,
        grid=(G,),
        in_specs=[
            pl.BlockSpec(memory_space=pltpu.MemorySpace.SMEM),       # inv_batch
            pl.BlockSpec((None, B, F), lambda g: (g, 0, 0)),         # kp_cropped
            pl.BlockSpec((None, B, F), lambda g: (g, 0, 0)),         # kp_original
            pl.BlockSpec((2 * F, NEURONS), lambda g: (0, 0)),        # w1 (reused)
            pl.BlockSpec((NEURONS, NEURONS), lambda g: (0, 0)),      # w2 (reused)
            pl.BlockSpec((NEURONS, NEURONS), lambda g: (0, 0)),      # w3 (reused)
            pl.BlockSpec((8, NEURONS), lambda g: (0, 0)),            # bn_pack
        ],
        out_specs=pl.BlockSpec((None, B, 1), lambda g: (g, 0, 0)),
    )

    return pl.pallas_call(
        discriminator_kernel,
        out_shape=jax.ShapeDtypeStruct((G, B, 1), jnp.float32),
        grid_spec=grid_spec,
        compiler_params=pltpu.CompilerParams(
            dimension_semantics=("parallel",),           # one batch per TC on v7x
            vmem_limit_bytes=8 * 1024 * 1024,
        ),
        cost_estimate=pl.CostEstimate(flops=flops,
                                      transcendentals=transcendentals,
                                      bytes_accessed=bytes_accessed),
    )(*args)


def discriminator_forward(params, kp_cropped, kp_original):
    """Accepts (B, F) for a single evaluation or (G, B, F) for fused stacks."""
    single = kp_cropped.ndim == 2
    if single:
        kp_cropped = kp_cropped[None]
        kp_original = kp_original[None]
    out = _discriminator_pallas(params, kp_cropped, kp_original)
    return out[0] if single else out


def discriminator_reference(params, kp_cropped, kp_original, *, use_f32_weights=False):
    """Pure-JAX mirror (same dtype casts unless use_f32_weights) for verification."""
    B = kp_cropped.shape[0]
    inv_batch = 1.0 / B
    bn = params["bn_pack"]
    if use_f32_weights:
        w1, w2, w3 = params["w1_f32"], params["w2_f32"], params["w3_f32"]
        cast = jnp.float32
    else:
        w1, w2, w3 = params["w1"], params["w2"], params["w3"]
        cast = WEIGHT_DTYPE

    def bn_lrelu(h, g, b):
        mean = jnp.sum(h, axis=0, keepdims=True) * inv_batch
        var = jnp.sum(h * h, axis=0, keepdims=True) * inv_batch - mean * mean
        scale = g * jax.lax.rsqrt(var + BN_EPS)
        hn = h * scale + (b - mean * scale)
        return jnp.maximum(hn, LRELU_SLOPE * hn)

    x = jnp.concatenate([kp_cropped, kp_original], axis=-1)
    h = jnp.dot(x.astype(cast), w1, preferred_element_type=jnp.float32)
    h = bn_lrelu(h, bn[ROW_G1:ROW_G1 + 1], bn[ROW_B1:ROW_B1 + 1])
    h = jnp.dot(h.astype(cast), w2, preferred_element_type=jnp.float32)
    h = bn_lrelu(h, bn[ROW_G2:ROW_G2 + 1], bn[ROW_B2:ROW_B2 + 1])
    h = jnp.dot(h.astype(cast), w3, preferred_element_type=jnp.float32)
    h = bn_lrelu(h, bn[ROW_G3:ROW_G3 + 1], bn[ROW_B3:ROW_B3 + 1])
    logits = jnp.sum(h * bn[ROW_W4:ROW_W4 + 1], axis=-1, keepdims=True)
    return 0.5 * (jnp.tanh(0.5 * logits) + 1.0)


if __name__ == "__main__":
    num_joints = 8            # image_size = 16, concat input = 32 features
    batch = 8
    F = num_joints * 2

    key = jax.random.PRNGKey(0)
    k_params, k_rc, k_ro, k_fc, k_fo = jax.random.split(key, 5)

    params = make_discriminator_params(num_joints, k_params)
    real_crop = jax.random.normal(k_rc, (batch, F), jnp.float32)
    real_orig = jax.random.normal(k_ro, (batch, F), jnp.float32)
    fake_crop = jax.random.normal(k_fc, (batch, F), jnp.float32)
    fake_orig = jax.random.normal(k_fo, (batch, F), jnp.float32)

    # Single evaluation (matches the PyTorch module's forward signature).
    out_single = jax.block_until_ready(
        discriminator_forward(params, real_crop, real_orig))

    # Fused real/fake evaluation: one pallas_call, grid=(2,) "parallel".
    out_pair = jax.block_until_ready(
        discriminator_forward(params,
                              jnp.stack([real_crop, fake_crop]),
                              jnp.stack([real_orig, fake_orig])))

    ref_real = discriminator_reference(params, real_crop, real_orig)
    ref_fake = discriminator_reference(params, fake_crop, fake_orig)
    ref_real_f32 = discriminator_reference(params, real_crop, real_orig,
                                           use_f32_weights=True)

    assert out_single.shape == (batch, 1)
    assert out_pair.shape == (2, batch, 1)
    assert bool(jnp.all(jnp.isfinite(out_single)))
    assert bool(jnp.all(jnp.isfinite(out_pair)))
    assert bool(jnp.all((out_single >= 0.0) & (out_single <= 1.0)))
    assert bool(jnp.all((out_pair >= 0.0) & (out_pair <= 1.0)))
    assert bool(jnp.max(jnp.abs(out_single - ref_real)) < 1e-2)
    assert bool(jnp.max(jnp.abs(out_pair[0] - ref_real)) < 1e-2)
    assert bool(jnp.max(jnp.abs(out_pair[1] - ref_fake)) < 1e-2)
    # fp32 fidelity check against full-precision weights (bf16 MXU path).
    assert bool(jnp.max(jnp.abs(out_single - ref_real_f32)) < 5e-2)
    print("KERNEL_OK")
</pallas_src>

<mosaic_0001>
module attributes {stable_mosaic.version = 11 : i64} {
  func.func @discriminator_kernel(%arg0: i32, %arg1: memref<1x1xf32, #tpu.memory_space<smem>>, %arg2: memref<1x8x16xf32, #tpu.memory_space<vmem>>, %arg3: memref<1x8x16xf32, #tpu.memory_space<vmem>>, %arg4: memref<32x256xbf16, #tpu.memory_space<vmem>>, %arg5: memref<256x256xbf16, #tpu.memory_space<vmem>>, %arg6: memref<256x256xbf16, #tpu.memory_space<vmem>>, %arg7: memref<8x256xf32, #tpu.memory_space<vmem>>, %arg8: memref<1x8x1xf32, #tpu.memory_space<vmem>>) attributes {dimension_semantics = [#tpu.dimension_semantics<parallel>], iteration_bounds = array<i64: 1>, scalar_prefetch = 0 : i64, scratch_operands = 0 : i64, tpu.core_type = #tpu.core_type<tc>, window_params = [{transform_indices = @transform_0, window_bounds = array<i64: 1, 1>}, {transform_indices = @transform_1, window_bounds = array<i64: 1, 8, 16>}, {transform_indices = @transform_2, window_bounds = array<i64: 1, 8, 16>}, {pipeline_mode = #tpu.pipeline_mode<synchronous>, transform_indices = @transform_3, window_bounds = array<i64: 32, 256>}, {pipeline_mode = #tpu.pipeline_mode<synchronous>, transform_indices = @transform_4, window_bounds = array<i64: 256, 256>}, {pipeline_mode = #tpu.pipeline_mode<synchronous>, transform_indices = @transform_5, window_bounds = array<i64: 256, 256>}, {pipeline_mode = #tpu.pipeline_mode<synchronous>, transform_indices = @transform_6, window_bounds = array<i64: 8, 256>}, {transform_indices = @transform_7, window_bounds = array<i64: 1, 8, 1>}]} {
    %c0 = arith.constant 0 : index
    %c0_0 = arith.constant 0 : index
    %0 = memref.load %arg1[%c0, %c0_0] : memref<1x1xf32, #tpu.memory_space<smem>>
    %c0_1 = arith.constant 0 : index
    %c0_2 = arith.constant 0 : index
    %c0_3 = arith.constant 0 : index
    %1 = vector.load %arg2[%c0_1, %c0_2, %c0_3] : memref<1x8x16xf32, #tpu.memory_space<vmem>>, vector<1x8x16xf32>
    %2 = vector.shape_cast %1 : vector<1x8x16xf32> to vector<8x16xf32>
    %3 = arith.truncf %2 : vector<8x16xf32> to vector<8x16xbf16>
    %c0_4 = arith.constant 0 : index
    %c0_5 = arith.constant 0 : index
    %4 = vector.load %arg4[%c0_4, %c0_5] : memref<32x256xbf16, #tpu.memory_space<vmem>>, vector<16x256xbf16>
    %cst = arith.constant dense<0.000000e+00> : vector<8x256xf32>
    %5 = tpu.matmul %3, %4, %cst {dimension_numbers = #tpu.dot_dimension_numbers<[1], [0], [0], [1], [0, 0, 1, 1], [], []>} : vector<8x16xbf16>, vector<16x256xbf16>, vector<8x256xf32> -> vector<8x256xf32>
    %c0_6 = arith.constant 0 : index
    %c0_7 = arith.constant 0 : index
    %c0_8 = arith.constant 0 : index
    %6 = vector.load %arg3[%c0_6, %c0_7, %c0_8] : memref<1x8x16xf32, #tpu.memory_space<vmem>>, vector<1x8x16xf32>
    %7 = vector.shape_cast %6 : vector<1x8x16xf32> to vector<8x16xf32>
    %8 = arith.truncf %7 : vector<8x16xf32> to vector<8x16xbf16>
    %c16 = arith.constant 16 : index
    %c0_9 = arith.constant 0 : index
    %9 = vector.load %arg4[%c16, %c0_9] : memref<32x256xbf16, #tpu.memory_space<vmem>>, vector<16x256xbf16>
    %cst_10 = arith.constant dense<0.000000e+00> : vector<8x256xf32>
    %10 = tpu.matmul %8, %9, %cst_10 {dimension_numbers = #tpu.dot_dimension_numbers<[1], [0], [0], [1], [0, 0, 1, 1], [], []>} : vector<8x16xbf16>, vector<16x256xbf16>, vector<8x256xf32> -> vector<8x256xf32>
    %11 = arith.addf %5, %10 : vector<8x256xf32>
    %c0_11 = arith.constant 0 : index
    %c0_12 = arith.constant 0 : index
    %12 = vector.load %arg7[%c0_11, %c0_12] : memref<8x256xf32, #tpu.memory_space<vmem>>, vector<1x256xf32>
    %c1 = arith.constant 1 : index
    %c0_13 = arith.constant 0 : index
    %13 = vector.load %arg7[%c1, %c0_13] : memref<8x256xf32, #tpu.memory_space<vmem>>, vector<1x256xf32>
    %cst_14 = arith.constant dense<0.000000e+00> : vector<256xf32>
    %14 = vector.multi_reduction <add>, %11, %cst_14 [0] : vector<8x256xf32> to vector<256xf32>
    %15 = vector.shape_cast %14 : vector<256xf32> to vector<1x256xf32>
    %16 = arith.mulf %11, %11 : vector<8x256xf32>
    %cst_15 = arith.constant dense<0.000000e+00> : vector<256xf32>
    %17 = vector.multi_reduction <add>, %16, %cst_15 [0] : vector<8x256xf32> to vector<256xf32>
    %18 = vector.shape_cast %17 : vector<256xf32> to vector<1x256xf32>
    %19 = vector.broadcast %0 : f32 to vector<1x256xf32>
    %20 = arith.mulf %15, %19 : vector<1x256xf32>
    %21 = vector.broadcast %0 : f32 to vector<1x256xf32>
    %22 = arith.mulf %18, %21 : vector<1x256xf32>
    %23 = arith.mulf %20, %20 : vector<1x256xf32>
    %24 = arith.subf %22, %23 : vector<1x256xf32>
    %cst_16 = arith.constant 8.000000e-01 : f32
    %25 = vector.broadcast %cst_16 : f32 to vector<1x256xf32>
    %26 = arith.addf %24, %25 : vector<1x256xf32>
    %27 = math.rsqrt %26 : vector<1x256xf32>
    %28 = arith.mulf %12, %27 : vector<1x256xf32>
    %29 = arith.mulf %20, %28 : vector<1x256xf32>
    %30 = arith.subf %13, %29 : vector<1x256xf32>
    %31 = vector.broadcast %28 : vector<1x256xf32> to vector<8x256xf32>
    %32 = arith.mulf %11, %31 : vector<8x256xf32>
    %33 = vector.broadcast %30 : vector<1x256xf32> to vector<8x256xf32>
    %34 = arith.addf %32, %33 : vector<8x256xf32>
    %cst_17 = arith.constant 2.000000e-01 : f32
    %35 = vector.broadcast %cst_17 : f32 to vector<8x256xf32>
    %36 = arith.mulf %35, %34 : vector<8x256xf32>
    %37 = arith.maximumf %34, %36 : vector<8x256xf32>
    %38 = arith.truncf %37 : vector<8x256xf32> to vector<8x256xbf16>
    %c0_18 = arith.constant 0 : index
    %c0_19 = arith.constant 0 : index
    %39 = vector.load %arg5[%c0_18, %c0_19] : memref<256x256xbf16, #tpu.memory_space<vmem>>, vector<256x256xbf16>
    %cst_20 = arith.constant dense<0.000000e+00> : vector<8x256xf32>
    %40 = tpu.matmul %38, %39, %cst_20 {dimension_numbers = #tpu.dot_dimension_numbers<[1], [0], [0], [1], [0, 0, 1, 1], [], []>} : vector<8x256xbf16>, vector<256x256xbf16>, vector<8x256xf32> -> vector<8x256xf32>
    %c2 = arith.constant 2 : index
    %c0_21 = arith.constant 0 : index
    %41 = vector.load %arg7[%c2, %c0_21] : memref<8x256xf32, #tpu.memory_space<vmem>>, vector<1x256xf32>
    %c3 = arith.constant 3 : index
    %c0_22 = arith.constant 0 : index
    %42 = vector.load %arg7[%c3, %c0_22] : memref<8x256xf32, #tpu.memory_space<vmem>>, vector<1x256xf32>
    %cst_23 = arith.constant dense<0.000000e+00> : vector<256xf32>
    %43 = vector.multi_reduction <add>, %40, %cst_23 [0] : vector<8x256xf32> to vector<256xf32>
    %44 = vector.shape_cast %43 : vector<256xf32> to vector<1x256xf32>
    %45 = arith.mulf %40, %40 : vector<8x256xf32>
    %cst_24 = arith.constant dense<0.000000e+00> : vector<256xf32>
    %46 = vector.multi_reduction <add>, %45, %cst_24 [0] : vector<8x256xf32> to vector<256xf32>
    %47 = vector.shape_cast %46 : vector<256xf32> to vector<1x256xf32>
    %48 = vector.broadcast %0 : f32 to vector<1x256xf32>
    %49 = arith.mulf %44, %48 : vector<1x256xf32>
    %50 = vector.broadcast %0 : f32 to vector<1x256xf32>
    %51 = arith.mulf %47, %50 : vector<1x256xf32>
    %52 = arith.mulf %49, %49 : vector<1x256xf32>
    %53 = arith.subf %51, %52 : vector<1x256xf32>
    %cst_25 = arith.constant 8.000000e-01 : f32
    %54 = vector.broadcast %cst_25 : f32 to vector<1x256xf32>
    %55 = arith.addf %53, %54 : vector<1x256xf32>
    %56 = math.rsqrt %55 : vector<1x256xf32>
    %57 = arith.mulf %41, %56 : vector<1x256xf32>
    %58 = arith.mulf %49, %57 : vector<1x256xf32>
    %59 = arith.subf %42, %58 : vector<1x256xf32>
    %60 = vector.broadcast %57 : vector<1x256xf32> to vector<8x256xf32>
    %61 = arith.mulf %40, %60 : vector<8x256xf32>
    %62 = vector.broadcast %59 : vector<1x256xf32> to vector<8x256xf32>
    %63 = arith.addf %61, %62 : vector<8x256xf32>
    %cst_26 = arith.constant 2.000000e-01 : f32
    %64 = vector.broadcast %cst_26 : f32 to vector<8x256xf32>
    %65 = arith.mulf %64, %63 : vector<8x256xf32>
    %66 = arith.maximumf %63, %65 : vector<8x256xf32>
    %67 = arith.truncf %66 : vector<8x256xf32> to vector<8x256xbf16>
    %c0_27 = arith.constant 0 : index
    %c0_28 = arith.constant 0 : index
    %68 = vector.load %arg6[%c0_27, %c0_28] : memref<256x256xbf16, #tpu.memory_space<vmem>>, vector<256x256xbf16>
    %cst_29 = arith.constant dense<0.000000e+00> : vector<8x256xf32>
    %69 = tpu.matmul %67, %68, %cst_29 {dimension_numbers = #tpu.dot_dimension_numbers<[1], [0], [0], [1], [0, 0, 1, 1], [], []>} : vector<8x256xbf16>, vector<256x256xbf16>, vector<8x256xf32> -> vector<8x256xf32>
    %c4 = arith.constant 4 : index
    %c0_30 = arith.constant 0 : index
    %70 = vector.load %arg7[%c4, %c0_30] : memref<8x256xf32, #tpu.memory_space<vmem>>, vector<1x256xf32>
    %c5 = arith.constant 5 : index
    %c0_31 = arith.constant 0 : index
    %71 = vector.load %arg7[%c5, %c0_31] : memref<8x256xf32, #tpu.memory_space<vmem>>, vector<1x256xf32>
    %cst_32 = arith.constant dense<0.000000e+00> : vector<256xf32>
    %72 = vector.multi_reduction <add>, %69, %cst_32 [0] : vector<8x256xf32> to vector<256xf32>
    %73 = vector.shape_cast %72 : vector<256xf32> to vector<1x256xf32>
    %74 = arith.mulf %69, %69 : vector<8x256xf32>
    %cst_33 = arith.constant dense<0.000000e+00> : vector<256xf32>
    %75 = vector.multi_reduction <add>, %74, %cst_33 [0] : vector<8x256xf32> to vector<256xf32>
    %76 = vector.shape_cast %75 : vector<256xf32> to vector<1x256xf32>
    %77 = vector.broadcast %0 : f32 to vector<1x256xf32>
    %78 = arith.mulf %73, %77 : vector<1x256xf32>
    %79 = vector.broadcast %0 : f32 to vector<1x256xf32>
    %80 = arith.mulf %76, %79 : vector<1x256xf32>
    %81 = arith.mulf %78, %78 : vector<1x256xf32>
    %82 = arith.subf %80, %81 : vector<1x256xf32>
    %cst_34 = arith.constant 8.000000e-01 : f32
    %83 = vector.broadcast %cst_34 : f32 to vector<1x256xf32>
    %84 = arith.addf %82, %83 : vector<1x256xf32>
    %85 = math.rsqrt %84 : vector<1x256xf32>
    %86 = arith.mulf %70, %85 : vector<1x256xf32>
    %87 = arith.mulf %78, %86 : vector<1x256xf32>
    %88 = arith.subf %71, %87 : vector<1x256xf32>
    %89 = vector.broadcast %86 : vector<1x256xf32> to vector<8x256xf32>
    %90 = arith.mulf %69, %89 : vector<8x256xf32>
    %91 = vector.broadcast %88 : vector<1x256xf32> to vector<8x256xf32>
    %92 = arith.addf %90, %91 : vector<8x256xf32>
    %cst_35 = arith.constant 2.000000e-01 : f32
    %93 = vector.broadcast %cst_35 : f32 to vector<8x256xf32>
    %94 = arith.mulf %93, %92 : vector<8x256xf32>
    %95 = arith.maximumf %92, %94 : vector<8x256xf32>
    %c6 = arith.constant 6 : index
    %c0_36 = arith.constant 0 : index
    %96 = vector.load %arg7[%c6, %c0_36] : memref<8x256xf32, #tpu.memory_space<vmem>>, vector<1x256xf32>
    %97 = vector.broadcast %96 : vector<1x256xf32> to vector<8x256xf32>
    %98 = arith.mulf %95, %97 : vector<8x256xf32>
    %cst_37 = arith.constant dense<0.000000e+00> : vector<8xf32>
    %99 = vector.multi_reduction <add>, %98, %cst_37 [1] : vector<8x256xf32> to vector<8xf32>
    %100 = vector.shape_cast %99 : vector<8xf32> to vector<8x1xf32>
    %cst_38 = arith.constant 5.000000e-01 : f32
    %101 = vector.broadcast %cst_38 : f32 to vector<8x1xf32>
    %102 = arith.mulf %101, %100 : vector<8x1xf32>
    %103 = math.tanh %102 : vector<8x1xf32>
    %cst_39 = arith.constant 1.000000e+00 : f32
    %104 = vector.broadcast %cst_39 : f32 to vector<8x1xf32>
    %105 = arith.addf %103, %104 : vector<8x1xf32>
    %cst_40 = arith.constant 5.000000e-01 : f32
    %106 = vector.broadcast %cst_40 : f32 to vector<8x1xf32>
    %107 = arith.mulf %106, %105 : vector<8x1xf32>
    %c0_41 = arith.constant 0 : index
    %c0_42 = arith.constant 0 : index
    %c0_43 = arith.constant 0 : index
    %108 = vector.load %arg8[%c0_41, %c0_42, %c0_43] : memref<1x8x1xf32, #tpu.memory_space<vmem>>, vector<1x8x1xf32>
    %109 = vector.shape_cast %108 : vector<1x8x1xf32> to vector<8x1xf32>
    %110 = vector.shape_cast %107 : vector<8x1xf32> to vector<1x8x1xf32>
    tpu.vector_store %arg8[%c0_41, %c0_42, %c0_43], %110 {strides = array<i32>} : memref<1x8x1xf32, #tpu.memory_space<vmem>>, vector<1x8x1xf32>,
    return
  }
  func.func @transform_0(%arg0: i32) -> (i32, i32) {
    %c0_i32 = arith.constant 0 : i32
    %c0_i32_0 = arith.constant 0 : i32
    %c0_i32_1 = arith.constant 0 : i32
    return %c0_i32, %c0_i32_0 : i32, i32
  }
  func.func @transform_1(%arg0: i32) -> (i32, i32, i32) {
    %c0_i32 = arith.constant 0 : i32
    %c0_i32_0 = arith.constant 0 : i32
    %c0_i32_1 = arith.constant 0 : i32
    return %arg0, %c0_i32, %c0_i32_0 : i32, i32, i32
  }
  func.func @transform_2(%arg0: i32) -> (i32, i32, i32) {
    %c0_i32 = arith.constant 0 : i32
    %c0_i32_0 = arith.constant 0 : i32
    %c0_i32_1 = arith.constant 0 : i32
    return %arg0, %c0_i32, %c0_i32_0 : i32, i32, i32
  }
  func.func @transform_3(%arg0: i32) -> (i32, i32) {
    %c0_i32 = arith.constant 0 : i32
    %c0_i32_0 = arith.constant 0 : i32
    %c0_i32_1 = arith.constant 0 : i32
    return %c0_i32, %c0_i32_0 : i32, i32
  }
  func.func @transform_4(%arg0: i32) -> (i32, i32) {
    %c0_i32 = arith.constant 0 : i32
    %c0_i32_0 = arith.constant 0 : i32
    %c0_i32_1 = arith.constant 0 : i32
    return %c0_i32, %c0_i32_0 : i32, i32
  }
  func.func @transform_5(%arg0: i32) -> (i32, i32) {
    %c0_i32 = arith.constant 0 : i32
    %c0_i32_0 = arith.constant 0 : i32
    %c0_i32_1 = arith.constant 0 : i32
    return %c0_i32, %c0_i32_0 : i32, i32
  }
  func.func @transform_6(%arg0: i32) -> (i32, i32) {
    %c0_i32 = arith.constant 0 : i32
    %c0_i32_0 = arith.constant 0 : i32
    %c0_i32_1 = arith.constant 0 : i32
    return %c0_i32, %c0_i32_0 : i32, i32
  }
  func.func @transform_7(%arg0: i32) -> (i32, i32, i32) {
    %c0_i32 = arith.constant 0 : i32
    %c0_i32_0 = arith.constant 0 : i32
    %c0_i32_1 = arith.constant 0 : i32
    return %arg0, %c0_i32, %c0_i32_0 : i32, i32, i32
  }
}

</mosaic_0001>

<bundles_post_ra>
// kernel: tpu_custom_call.1
= control target key start
LH: loop header
LB: loop body
LE: loop exit
PB: predicated region body
PF: predicated region fallthrough
CT: control target
= control target key end

     0   :  { %13 = vsyncpa [#allocation4], 0  ;;  %s1527_s0 = inlined_call_operand.<no memory space> [shape: f32[1,1], index: 0, kind: input, shape index: {}]   ;;  %s1528_s1 = inlined_call_operand.hbm [shape: f32[1,8,16], index: 1, kind: input, shape index: {}]   ;;  %s1529_s2 = inlined_call_operand.hbm [shape: f32[1,8,16], index: 2, kind: input, shape index: {}]   ;;  %s1530_s3 = inlined_call_operand.hbm [shape: bf16[32,256], index: 3, kind: input, shape index: {}]   ;;  %s1531_s4 = inlined_call_operand.hbm [shape: bf16[256,256], index: 4, kind: input, shape index: {}]   ;;  %s1532_s5 = inlined_call_operand.hbm [shape: bf16[256,256], index: 5, kind: input, shape index: {}]   ;;  %s1533_s6 = inlined_call_operand.hbm [shape: f32[8,256], index: 6, kind: input, shape index: {}]   ;;  %s1534_s7 = inlined_call_operand.vmem [shape: f32[1,8,1], index: 7, kind: output, shape index: {}]  }
   0x1   :  { %14 = vsyncpa [#allocation6], 0 }
   0x2   :  { %15 = vsyncpa [#allocation9], 0 }
   0x3   :  { %16 = vsyncpa [#allocation12], 0  ;;  %s1384_s24 = smov [#allocation5]  }
   0x4   :  { %s35_s25 = sshll.u32 %s1384_s24, 4  ;;  %s36_s25 = int_to_ptr.vmem [resolvable:$true] %s35_s25 }
   0x5   :  { %s1264_s26 = scalar_lea.vmem %s36_s25, 128  ;;  %p1269_p1 = scmp.lt.s32.totalorder %s36_s25, %s36_s25 }
   0x6   :  { %p1265_p0 = scmp.ne.s32.totalorder %s36_s25, %s1264_s26  ;;  %p1270_p2 = scmp.lt.s32.totalorder %s1264_s26, %s1264_s26 }
   0x8   :  { %p1271_p3 = por %p1270_p2, %p1269_p1 }
   0xa   :  { %p1272_p4 = pnand %p1271_p3, %p1265_p0 }
   0xc   :  { %1275 = shalt.err (!%p1272_p4)
}
   0xd   :  { %38 = dma.hbm_to_vmem [thread:$0]  %s1529_s2, 128, %s36_s25, [#allocation6]  }
   0xe   :  { %s1385_s29 = smov [#allocation8]   ;;  %s1386_s8 = smov [#allocation3]  }
   0xf   :  { %s56_s30 = sshll.u32 %s1385_s29, 4  ;;  %s25_s9 = sshll.u32 %s1386_s8, 4  ;;  %s57_s30 = int_to_ptr.vmem [resolvable:$true] %s56_s30  ;;  %s26_s9 = int_to_ptr.vmem [resolvable:$true] %s25_s9 }
  0x10   :  { %s1284_s10 = scalar_lea.vmem %s57_s30, 4096  ;;  %p1289_p6 = scmp.lt.s32.totalorder %s57_s30, %s57_s30 }
  0x11   :  { %p1285_p5 = scmp.ne.s32.totalorder %s57_s30, %s1284_s10  ;;  %p1290_p7 = scmp.lt.s32.totalorder %s1284_s10, %s1284_s10 }
  0x13   :  { %p1291_p8 = por %p1290_p7, %p1289_p6 }
  0x15   :  { %p1292_p9 = pnand %p1291_p8, %p1285_p5 }
  0x17   :  { %1295 = shalt.err (!%p1292_p9)
}
  0x18   :  { %s1387_s11 = smov 128   ;;  %s1388_s12 = smov 8  }
  0x19   :  { %62 = dma.hbm_to_vmem [thread:$0]  %s1531_s4, 4096, %s57_s30, [#allocation9], %s1387_s11, %s1387_s11, %s1388_s12  }
  0x1a   :  { %s1304_s2 = scalar_lea.vmem %s26_s9, 128  ;;  %p1309_p11 = scmp.lt.s32.totalorder %s26_s9, %s26_s9 }
  0x1b   :  { %p1305_p10 = scmp.ne.s32.totalorder %s26_s9, %s1304_s2  ;;  %p1310_p12 = scmp.lt.s32.totalorder %s1304_s2, %s1304_s2 }
  0x1d   :  { %p1311_p13 = por %p1310_p12, %p1309_p11 }
  0x1f   :  { %p1312_p0 = pnand %p1311_p13, %p1305_p10 }
  0x21   :  { %1315 = shalt.err (!%p1312_p0)
}
  0x22   :  { %28 = dma.hbm_to_vmem [thread:$0]  %s1528_s1, 128, %s26_s9, [#allocation4]  }
  0x23   :  { %s1389_s17 = smov [#allocation7]   ;;  %s1390_s19 = smov [#allocation10]  }
  0x24   :  { %s44_s18 = sshll.u32 %s1389_s17, 4  ;;  %s68_s20 = sshll.u32 %s1390_s19, 4  ;;  %s45_s18 = int_to_ptr.vmem [resolvable:$true] %s44_s18  ;;  %s69_s20 = int_to_ptr.vmem [resolvable:$true] %s68_s20 }
  0x25   :  { %s1324_s21 = scalar_lea.vmem %s45_s18, 512  ;;  %p1329_p2 = scmp.lt.s32.totalorder %s45_s18, %s45_s18 }
  0x26   :  { %p1325_p1 = scmp.ne.s32.totalorder %s45_s18, %s1324_s21  ;;  %p1330_p3 = scmp.lt.s32.totalorder %s1324_s21, %s1324_s21 }
  0x28   :  { %p1331_p4 = por %p1330_p3, %p1329_p2 }
  0x2a   :  { %p1332_p5 = pnand %p1331_p4, %p1325_p1 }
  0x2c   :  { %1335 = shalt.err (!%p1332_p5)
}
  0x2d   :  { %50 = dma.hbm_to_vmem [thread:$0]  %s1530_s3, 512, %s45_s18, [#allocation6], %s1387_s11, %s1387_s11, %s1388_s12  }
  0x2e   :  { %s1344_s1 = scalar_lea.vmem %s69_s20, 4096  ;;  %p1349_p7 = scmp.lt.s32.totalorder %s69_s20, %s69_s20 }
  0x2f   :  { %p1345_p6 = scmp.ne.s32.totalorder %s69_s20, %s1344_s1  ;;  %p1350_p8 = scmp.lt.s32.totalorder %s1344_s1, %s1344_s1 }
  0x31   :  { %p1351_p9 = por %p1350_p8, %p1349_p7 }
  0x33   :  { %p1352_p10 = pnand %p1351_p9, %p1345_p6 }
  0x35   :  { %1355 = shalt.err (!%p1352_p10)
}
  0x36   :  { %74 = dma.hbm_to_vmem [thread:$0]  %s1532_s5, 4096, %s69_s20, [#allocation9], %s1387_s11, %s1387_s11, %s1388_s12  }
  0x37   :  { %s1391_s25 = smov [#allocation11]  }
  0x38   :  { %s81_s26 = sshll.u32 %s1391_s25, 4  ;;  %s82_s26 = int_to_ptr.vmem [resolvable:$true] %s81_s26 }
  0x39   :  { %s1364_s27 = scalar_lea.vmem %s82_s26, 256  ;;  %p1369_p12 = scmp.lt.s32.totalorder %s82_s26, %s82_s26 }
  0x3a   :  { %p1365_p11 = scmp.ne.s32.totalorder %s82_s26, %s1364_s27  ;;  %p1370_p13 = scmp.lt.s32.totalorder %s1364_s27, %s1364_s27 }
  0x3c   :  { %p1371_p0 = por %p1370_p13, %p1369_p12 }
  0x3e   :  { %p1372_p1 = pnand %p1371_p0, %p1365_p11 }
  0x40   :  { %1375 = shalt.err (!%p1372_p1)
}
  0x41   :  { %84 = dma.hbm_to_vmem [thread:$0]  %s1533_s6, 256, %s82_s26, [#allocation12]  }
  0x42   :  { %1376 = dma.done.wait [#allocation4], 128  }
  0x43   :  { %1377 = vsyncadd [#allocation4], 4294967168 }
  0x44   :  { %1378 = dma.done.wait [#allocation6], 640  }
  0x45   :  { %1379 = vsyncadd [#allocation6], 4294966656 }
  0x46   :  { %1380 = dma.done.wait [#allocation9], 8192  }
  0x47   :  { %1381 = vsyncadd [#allocation9], 4294959104 }
  0x48   :  { %1382 = dma.done.wait [#allocation12], 256  }
  0x49   :  { %1383 = vsyncadd [#allocation12], 4294967040  ;;  %v1392_v0 = vmov 0   ;;  %v1140_v1 = vld [vmem:[#allocation7 + $0x14] ss:$8 sps:$4 sm:$0xff]   ;;  %vm123_vm0 = vcmask 130048  }
  0x4a   :  { %159 = vmatprep.mubr.bf16.mxu0 %v1392_v0  ;;  %213 = vmatprep.mubr.bf16.mxu1 %v1392_v0  ;;  %v1142_v2 = vld [vmem:[#allocation7 + $0x4] ss:$8 sps:$4 sm:$0xff]   ;;  %v1144_v3 = vld [vmem:[#allocation7 + $0x10] ss:$8 sps:$4 sm:$0xff]   ;;  %v1145_v4 = vld [vmem:[#allocation7] ss:$8 sps:$4 sm:$0xff]  }
  0x4b   :  { %141 = vmatprep.subr.bf16.mxu0 %v1140_v1  ;;  %v109_v5 = vld [vmem:[#allocation5] sm:$0xff]  ;;  %195 = vmatprep.subr.bf16.mxu1 %v1142_v2  ;;  %v105_v7 = vld [vmem:[#allocation3] sm:$0xff]  ;;  %v1151_v11 = vld [vmem:[#allocation8 + $0x64] ss:$8 sps:$4 sm:$0xff]   ;;  %vm1050_vm1 = vcmask 7168  }
  0x4c   :  { %v110_v6 = vpack.c.bf16 %v109_v5, %v109_v5  ;;  %142 = vmatpush1.bf16.msra.mxu0 %v1144_v3  ;;  %196 = vmatpush1.bf16.msra.mxu1 %v1145_v4  ;;  %v106_v8 = vpack.c.bf16 %v105_v7, %v105_v7  ;;  %v1148_v9 = vld [vmem:[#allocation8 + $0x74] ss:$8 sps:$4 sm:$0xff]   ;;  %v1146_v10 = vld [vmem:[#allocation8 + $0x70] ss:$8 sps:$4 sm:$0xff]   ;;  %v1149_v12 = vld [vmem:[#allocation8 + $0x60] ss:$8 sps:$4 sm:$0xff]   ;;  %v1476_v5 = vstv %s1527_s0 }
  0x4d   :  { %528 = vmatprep.subr.bf16.mxu0 %v1148_v9  ;;  %v1154_v13 = vld [vmem:[#allocation8 + $0x54] ss:$8 sps:$4 sm:$0xff]   ;;  %v1152_v14 = vld [vmem:[#allocation8 + $0x50] ss:$8 sps:$4 sm:$0xff]   ;;  %v1157_v15 = vld [vmem:[#allocation8 + $0x44] ss:$8 sps:$4 sm:$0xff]  }
  0x4e   :  { %v1155_v16 = vld [vmem:[#allocation8 + $0x40] ss:$8 sps:$4 sm:$0xff]   ;;  %v1160_v17 = vld [vmem:[#allocation8 + $0x34] ss:$8 sps:$4 sm:$0xff]   ;;  %v1158_v18 = vld [vmem:[#allocation8 + $0x30] ss:$8 sps:$4 sm:$0xff]  }
  0x4f   :  { %1062 = vmatmul.mubr.msk.bf16.vlgmr.msra.gmra.mxu0 %vm123_vm0, %v110_v6  ;;  %1065 = vmatmul.mubr.msk.bf16.vlgmr.msra.gmra.mxu1 %vm123_vm0, %v106_v8  ;;  %v1161_v19 = vld [vmem:[#allocation8 + $0x20] ss:$8 sps:$4 sm:$0xff]   ;;  %v1163_v20 = vld [vmem:[#allocation8 + $0x24] ss:$8 sps:$4 sm:$0xff]   ;;  %v1166_v21 = vld [vmem:[#allocation8 + $0x14] ss:$8 sps:$4 sm:$0xff]  }
  0x50   :  { %529 = vmatpush1.bf16.msra.mxu0 %v1146_v10  ;;  %v1164_v22 = vld [vmem:[#allocation8 + $0x10] ss:$8 sps:$4 sm:$0xff]   ;;  %v1169_v23 = vld [vmem:[#allocation8 + $0x4] ss:$8 sps:$4 sm:$0xff]   ;;  %v1167_v24 = vld [vmem:[#allocation8] ss:$8 sps:$4 sm:$0xff]  }
  0x51   :  { %530 = vmatprep.subr.bf16.mxu0 %v1151_v11  ;;  %v1172_v25 = vld [vmem:[#allocation8 + $0xf4] ss:$8 sps:$4 sm:$0xff]   ;;  %v1170_v26 = vld [vmem:[#allocation8 + $0xf0] ss:$8 sps:$4 sm:$0xff]   ;;  %v1175_v27 = vld [vmem:[#allocation8 + $0xe4] ss:$8 sps:$4 sm:$0xff]  }
  0x52   :  { %v1173_v28 = vld [vmem:[#allocation8 + $0xe0] ss:$8 sps:$4 sm:$0xff]   ;;  %v1178_v29 = vld [vmem:[#allocation8 + $0xd4] ss:$8 sps:$4 sm:$0xff]   ;;  %v1176_v30 = vld [vmem:[#allocation8 + $0xd0] ss:$8 sps:$4 sm:$0xff]  }
  0x53   :  { %v1181_v31 = vld [vmem:[#allocation8 + $0xc4] ss:$8 sps:$4 sm:$0xff]   ;;  %v1179_v32 = vld [vmem:[#allocation8 + $0xc0] ss:$8 sps:$4 sm:$0xff]   ;;  %v1184_v33 = vld [vmem:[#allocation8 + $0xb4] ss:$8 sps:$4 sm:$0xff]  }
  0x54   :  { %531 = vmatpush1.bf16.msra.mxu0 %v1149_v12  ;;  %v1182_v34 = vld [vmem:[#allocation8 + $0xb0] ss:$8 sps:$4 sm:$0xff]   ;;  %v1187_v35 = vld [vmem:[#allocation8 + $0xa4] ss:$8 sps:$4 sm:$0xff]   ;;  %v1185_v36 = vld [vmem:[#allocation8 + $0xa0] ss:$8 sps:$4 sm:$0xff]  }
  0x55   :  { %532 = vmatprep.subr.bf16.mxu0 %v1154_v13  ;;  %v1190_v37 = vld [vmem:[#allocation8 + $0x94] ss:$8 sps:$4 sm:$0xff]   ;;  %v1188_v38 = vld [vmem:[#allocation8 + $0x90] ss:$8 sps:$4 sm:$0xff]   ;;  %v1193_v39 = vld [vmem:[#allocation8 + $0x84] ss:$8 sps:$4 sm:$0xff]  }
  0x56   :  { %v1191_v40 = vld [vmem:[#allocation8 + $0x80] ss:$8 sps:$4 sm:$0xff]  }
  0x58   :  { %533 = vmatpush1.bf16.msra.mxu0 %v1152_v14 }
  0x59   :  { %534 = vmatprep.subr.bf16.mxu0 %v1157_v15 }
  0x5c   :  { %535 = vmatpush1.bf16.msra.mxu0 %v1155_v16 }
  0x5d   :  { %536 = vmatprep.subr.bf16.mxu0 %v1160_v17 }
  0x60   :  { %537 = vmatpush1.bf16.msra.mxu0 %v1158_v18 }
  0x61   :  { %538 = vmatprep.subr.bf16.mxu0 %v1163_v20 }
  0x64   :  { %539 = vmatpush1.bf16.msra.mxu0 %v1161_v19 }
  0x65   :  { %540 = vmatprep.subr.bf16.mxu0 %v1166_v21 }
  0x68   :  { %541 = vmatpush1.bf16.msra.mxu0 %v1164_v22 }
  0x69   :  { %542 = vmatprep.subr.bf16.mxu0 %v1169_v23 }
  0x6c   :  { %543 = vmatpush1.bf16.msra.mxu0 %v1167_v24  ;;  %v1393_v24 = vmov 1966171168  }
  0x6d   :  { %544 = vmatprep.subr.bf16.mxu0 %v1172_v25  ;;  %v268_v25 = vunpack.c.l.s4 %v1393_v24  ;;  %v1233_v24 = vld [vmem:[#allocation10 + $0xa0] ss:$8 sps:$4 sm:$0xff]  }
  0x70   :  { %545 = vmatpush2.bf16.msra.mxu0 %v1170_v26  ;;  %v270_v26 = vlaneseq }
  0x71   :  { %546 = vmatprep.subr.bf16.mxu0 %v1175_v27  ;;  %v269_v27 = vunpack.c.0.s8 %v268_v25  ;;  %v1238_v25 = vld [vmem:[#allocation10 + $0x94] ss:$8 sps:$4 sm:$0xff]  }
  0x74   :  { %547 = vmatpush2.bf16.msra.mxu0 %v1173_v28  ;;  %v271_v28 = vshrl.u32 %v270_v26, 7  ;;  %v1236_v26 = vld [vmem:[#allocation10 + $0x90] ss:$8 sps:$4 sm:$0xff]  }
  0x75   :  { %548 = vmatprep.subr.bf16.mxu0 %v1178_v29 }
  0x78   :  { %549 = vmatpush2.bf16.msra.mxu0 %v1176_v30  ;;  %v1482_v30 = vsub.s32 %v269_v27, %v271_v28  ;;  %v1241_v27 = vld [vmem:[#allocation10 + $0x84] ss:$8 sps:$4 sm:$0xff]  }
  0x79   :  { %550 = vmatprep.subr.bf16.mxu0 %v1181_v31 }
  0x7c   :  { %551 = vmatpush2.bf16.msra.mxu0 %v1179_v32 }
  0x7d   :  { %552 = vmatprep.subr.bf16.mxu0 %v1184_v33 }
  0x80   :  { %553 = vmatpush2.bf16.msra.mxu0 %v1182_v34  ;;  %v222_v34 = vld [vmem:[#allocation11] ss:$8 sm:$0x3] }
  0x81   :  { %554 = vmatprep.subr.bf16.mxu0 %v1187_v35 }
  0x84   :  { %555 = vmatpush2.bf16.msra.mxu0 %v1185_v36  ;;  %v1486_v36 = vsub.s32 0, %v271_v28 }
  0x85   :  { %556 = vmatprep.subr.bf16.mxu0 %v1190_v37  ;;  %v1488_v37 = vsub.s32 1, %v271_v28  ;;  %v1239_v28 = vld [vmem:[#allocation10 + $0x80] ss:$8 sps:$4 sm:$0xff]  }
  0x88   :  { %557 = vmatpush2.bf16.msra.mxu0 %v1188_v38 }
  0x89   :  { %558 = vmatprep.subr.bf16.mxu0 %v1193_v39 }
  0x8c   :  { %559 = vmatpush2.bf16.msra.mxu0 %v1191_v40 }
 0x10f   :  { %v161_v41 = vpop.f32.mrf.mxu0  ;;  %v215_v42 = vpop.f32.mrf.mxu1 }
 0x110   :  { %v1461_v43 = vadd.f32 %v215_v42, %v161_v41 }
 0x111   :  { %v163_v44 = vpop.f32.mrf.mxu0  ;;  %v217_v45 = vpop.f32.mrf.mxu1 }
 0x112   :  { %v225_v46 = vrot.slane %v1461_v43, 4  ;;  %v237_v47 = vmul.f32 %v1461_v43, %v1461_v43  ;;  %v1466_v48 = vadd.f32 %v217_v45, %v163_v44 }
 0x113   :  { %v165_v49 = vpop.f32.mrf.mxu0  ;;  %v219_v50 = vpop.f32.mrf.mxu1 }
 0x114   :  { %v226_v51 = vadd.f32 %v225_v46, %v1461_v43  ;;  %v239_v52 = vrot.slane %v237_v47, 4  ;;  %v231_v53 = vrot.slane %v1466_v48, 4  ;;  %v238_v54 = vmul.f32 %v1466_v48, %v1466_v48  ;;  %v224_v46 = vld [vmem:[#allocation11 + $0x1] ss:$8 sm:$0x3] }
 0x115   :  { %v166_v55 = vpop.f32.mrf.mxu0  ;;  %v220_v56 = vpop.f32.mrf.mxu1 }
 0x116   :  { %v227_v57 = vrot.slane %v226_v51, 2  ;;  %v240_v58 = vadd.f32 %v239_v52, %v237_v47  ;;  %v232_v59 = vadd.f32 %v231_v53, %v1466_v48  ;;  %v245_v60 = vrot.slane %v238_v54, 4 }
 0x118   :  { %v228_v61 = vadd.f32 %v227_v57, %v226_v51  ;;  %v241_v62 = vrot.slane %v240_v58, 2  ;;  %v233_v63 = vrot.slane %v232_v59, 2  ;;  %v246_v0 = vadd.f32 %v245_v60, %v238_v54 }
 0x11a   :  { %v229_v1 = vrot.slane %v228_v61, 1  ;;  %v242_v2 = vadd.f32 %v241_v62, %v240_v58  ;;  %v234_v3 = vadd.f32 %v233_v63, %v232_v59  ;;  %v247_v4 = vrot.slane %v246_v0, 2  ;;  %v1196_v62 = vld [vmem:[#allocation10 + $0x74] ss:$8 sps:$4 sm:$0xff]   ;;  %v1194_v63 = vld [vmem:[#allocation10 + $0x70] ss:$8 sps:$4 sm:$0xff]  }
 0x11b   :  { %875 = vmatprep.subr.bf16.mxu1 %v1196_v62 }
 0x11c   :  { %v230_v6 = vadd.f32 %v229_v1, %v228_v61  ;;  %v243_v7 = vrot.slane %v242_v2, 1  ;;  %v235_v8 = vrot.slane %v234_v3, 1  ;;  %v248_v9 = vadd.f32 %v247_v4, %v246_v0  ;;  %876 = vmatpush1.bf16.msra.mxu1 %v1194_v63  ;;  %v1197_v0 = vld [vmem:[#allocation10 + $0x60] ss:$8 sps:$4 sm:$0xff]   ;;  %v1200_v1 = vld [vmem:[#allocation10 + $0x50] ss:$8 sps:$4 sm:$0xff]  }
 0x11d   :  { %v1208_v4 = vld [vmem:[#allocation10 + $0x34] ss:$8 sps:$4 sm:$0xff]  }
 0x11e   :  { %v244_v10 = vadd.f32 %v243_v7, %v242_v2  ;;  %v252_v11 = vmul.f32 %v1476_v5, %v230_v6  ;;  %v236_v12 = vadd.f32 %v235_v8, %v234_v3  ;;  %v249_v13 = vrot.slane %v248_v9, 1  ;;  %v1205_v2 = vld [vmem:[#allocation10 + $0x44] ss:$8 sps:$4 sm:$0xff]   ;;  %v1203_v3 = vld [vmem:[#allocation10 + $0x40] ss:$8 sps:$4 sm:$0xff]  }
 0x11f   :  { %v1206_v6 = vld [vmem:[#allocation10 + $0x30] ss:$8 sps:$4 sm:$0xff]   ;;  %v1211_v7 = vld [vmem:[#allocation10 + $0x24] ss:$8 sps:$4 sm:$0xff]   ;;  %v1209_v8 = vld [vmem:[#allocation10 + $0x20] ss:$8 sps:$4 sm:$0xff]  }
 0x120   :  { %v254_v14 = vmul.f32 %v1476_v5, %v244_v10  ;;  %v256_v15 = vmul.f32 %v252_v11, %v252_v11  ;;  %v250_v16 = vadd.f32 %v249_v13, %v248_v9  ;;  %v253_v17 = vmul.f32 %v1476_v5, %v236_v12  ;;  %v1214_v9 = vld [vmem:[#allocation10 + $0x14] ss:$8 sps:$4 sm:$0xff]   ;;  %v1212_v10 = vld [vmem:[#allocation10 + $0x10] ss:$8 sps:$4 sm:$0xff]   ;;  %v1215_v12 = vld [vmem:[#allocation10] ss:$8 sps:$4 sm:$0xff]  }
 0x121   :  { %v1220_v13 = vld [vmem:[#allocation10 + $0xf4] ss:$8 sps:$4 sm:$0xff]  }
 0x122   :  { %v258_v18 = vsub.f32 %v254_v14, %v256_v15  ;;  %v255_v19 = vmul.f32 %v1476_v5, %v250_v16  ;;  %v257_v20 = vmul.f32 %v253_v17, %v253_v17  ;;  %v1218_v14 = vld [vmem:[#allocation10 + $0xf0] ss:$8 sps:$4 sm:$0xff]   ;;  %v1223_v15 = vld [vmem:[#allocation10 + $0xe4] ss:$8 sps:$4 sm:$0xff]   ;;  %v1221_v16 = vld [vmem:[#allocation10 + $0xe0] ss:$8 sps:$4 sm:$0xff]  }
 0x124   :  { %v260_v21 = vadd.f32 0.8, %v258_v18  ;;  %v259_v22 = vsub.f32 %v255_v19, %v257_v20  ;;  %v1224_v18 = vld [vmem:[#allocation10 + $0xd0] ss:$8 sps:$4 sm:$0xff]   ;;  %v1229_v19 = vld [vmem:[#allocation10 + $0xc4] ss:$8 sps:$4 sm:$0xff]  }
 0x125   :  { %v1227_v20 = vld [vmem:[#allocation10 + $0xc0] ss:$8 sps:$4 sm:$0xff]  }
 0x126   :  { %v261_v23 = vadd.f32 0.8, %v259_v22  ;;  %1242 = vrsqrt.f32 %v260_v21  ;;  %v1232_v21 = vld [vmem:[#allocation10 + $0xb4] ss:$8 sps:$4 sm:$0xff]   ;;  %v1230_v22 = vld [vmem:[#allocation10 + $0xb0] ss:$8 sps:$4 sm:$0xff]  }
 0x128   :  { %1244 = vrsqrt.f32 %v261_v23  ;;  %v1235_v23 = vld [vmem:[#allocation10 + $0xa4] ss:$8 sps:$4 sm:$0xff]  }
 0x133   :  { %v1243_v29 = vpop.eup %1242 }
 0x135   :  { %v1245_v31 = vpop.eup %1244 }
 0x136   :  { %v266_v32 = vcombine.low %v1243_v29, %v1245_v31 }
 0x138   :  { %v273_v33 = vrot.slane %v266_v32, %v1482_v30 }
 0x13a   :  { %v280_v35 = vrot.slane %v273_v33, %v1482_v30 }
 0x13c   :  { %v282_v38 = vmul.f32 %v280_v35, %v222_v34 }
 0x13e   :  { %v287_v39 = vrot.slane %v282_v38, %v1486_v36  ;;  %v291_v40 = vrot.slane %v282_v38, %v1488_v37 }
 0x140   :  { %v294_v41 = vmul.f32 %v287_v39, %v252_v11  ;;  %v295_v42 = vmul.f32 %v291_v40, %v253_v17  ;;  %v316_v50 = vmul.f32 %v291_v40, %v1466_v48  ;;  %v315_v52 = vmul.f32 %v287_v39, %v1461_v43  ;;  %v1199_v48 = vld [vmem:[#allocation10 + $0x64] ss:$8 sps:$4 sm:$0xff]   ;;  %v1202_v43 = vld [vmem:[#allocation10 + $0x54] ss:$8 sps:$4 sm:$0xff]  }
 0x141   :  { %877 = vmatprep.subr.bf16.mxu1 %v1199_v48  ;;  %v1217_v11 = vld [vmem:[#allocation10 + $0x4] ss:$8 sps:$4 sm:$0xff]   ;;  %v1226_v17 = vld [vmem:[#allocation10 + $0xd4] ss:$8 sps:$4 sm:$0xff]  }
 0x142   :  { %v298_v44 = vcombine.low %v294_v41, %v295_v42  ;;  %878 = vmatpush1.bf16.msra.mxu1 %v1197_v0 }
 0x143   :  { %879 = vmatprep.subr.bf16.mxu1 %v1202_v43 }
 0x144   :  { %v305_v45 = vrot.slane %v298_v44, %v1482_v30 }
 0x146   :  { %v312_v47 = vrot.slane %v305_v45, %v1482_v30  ;;  %880 = vmatpush1.bf16.msra.mxu1 %v1200_v1 }
 0x147   :  { %881 = vmatprep.subr.bf16.mxu1 %v1205_v2 }
 0x148   :  { %v314_v49 = vsub.f32 %v224_v46, %v312_v47 }
 0x14a   :  { %v325_v51 = vrot.slane %v314_v49, %v1488_v37  ;;  %v321_v53 = vrot.slane %v314_v49, %v1486_v36  ;;  %882 = vmatpush1.bf16.msra.mxu1 %v1203_v3 }
 0x14b   :  { %883 = vmatprep.subr.bf16.mxu1 %v1208_v4 }
 0x14c   :  { %v329_v54 = vadd.f32 %v325_v51, %v316_v50  ;;  %v328_v55 = vadd.f32 %v321_v53, %v315_v52 }
 0x14e   :  { %v331_v56 = vmul.f32 0.2, %v329_v54  ;;  %v330_v57 = vmul.f32 0.2, %v328_v55  ;;  %884 = vmatpush1.bf16.msra.mxu1 %v1206_v6 }
 0x14f   :  { %885 = vmatprep.subr.bf16.mxu1 %v1211_v7 }
 0x150   :  { %v333_v58 = vmax.f32 %v329_v54, %v331_v56  ;;  %v332_v59 = vmax.f32 %v328_v55, %v330_v57 }
 0x152   :  { %v335_v60 = vpack.c.bf16 %v333_v58, %v333_v58  ;;  %v334_v61 = vpack.c.bf16 %v332_v59, %v332_v59  ;;  %886 = vmatpush1.bf16.msra.mxu1 %v1209_v8 }
 0x153   :  { %887 = vmatprep.subr.bf16.mxu1 %v1214_v9 }
 0x154   :  { %560 = vmatprep.mubr.bf16.mxu0 %v335_v60 }
 0x155   :  { %561 = vmatmul.mubr.bf16.vlgmr.msra.gmra.mxu0 %v334_v61 }
 0x156   :  { %888 = vmatpush1.bf16.msra.mxu1 %v1212_v10 }
 0x157   :  { %889 = vmatprep.subr.bf16.mxu1 %v1217_v11 }
 0x15a   :  { %890 = vmatpush1.bf16.msra.mxu1 %v1215_v12 }
 0x15b   :  { %891 = vmatprep.subr.bf16.mxu1 %v1220_v13  ;;  %v570_v13 = vld [vmem:[#allocation11 + $0x2] ss:$8 sm:$0x3] }
 0x15e   :  { %892 = vmatpush2.bf16.msra.mxu1 %v1218_v14 }
 0x15f   :  { %893 = vmatprep.subr.bf16.mxu1 %v1223_v15 }
 0x162   :  { %894 = vmatpush2.bf16.msra.mxu1 %v1221_v16 }
 0x163   :  { %895 = vmatprep.subr.bf16.mxu1 %v1226_v17 }
 0x166   :  { %896 = vmatpush2.bf16.msra.mxu1 %v1224_v18 }
 0x167   :  { %897 = vmatprep.subr.bf16.mxu1 %v1229_v19 }
 0x16a   :  { %898 = vmatpush2.bf16.msra.mxu1 %v1227_v20 }
 0x16b   :  { %899 = vmatprep.subr.bf16.mxu1 %v1232_v21 }
 0x16e   :  { %900 = vmatpush2.bf16.msra.mxu1 %v1230_v22  ;;  %v572_v22 = vld [vmem:[#allocation11 + $0x3] ss:$8 sm:$0x3] }
 0x16f   :  { %901 = vmatprep.subr.bf16.mxu1 %v1235_v23 }
 0x172   :  { %902 = vmatpush2.bf16.msra.mxu1 %v1233_v24 }
 0x173   :  { %903 = vmatprep.subr.bf16.mxu1 %v1238_v25 }
 0x176   :  { %904 = vmatpush2.bf16.msra.mxu1 %v1236_v26 }
 0x177   :  { %905 = vmatprep.subr.bf16.mxu1 %v1241_v27 }
 0x17a   :  { %906 = vmatpush2.bf16.msra.mxu1 %v1239_v28 }
 0x215   :  { %v562_v29 = vpop.f32.mrf.mxu0 }
 0x216   :  { %v573_v31 = vrot.slane %v562_v29, 4  ;;  %v585_v32 = vmul.f32 %v562_v29, %v562_v29 }
 0x217   :  { %v564_v33 = vpop.f32.mrf.mxu0 }
 0x218   :  { %v574_v34 = vadd.f32 %v573_v31, %v562_v29  ;;  %v587_v35 = vrot.slane %v585_v32, 4  ;;  %v579_v38 = vrot.slane %v564_v33, 4  ;;  %v586_v39 = vmul.f32 %v564_v33, %v564_v33 }
 0x219   :  { %v566_v40 = vpop.f32.mrf.mxu0 }
 0x21a   :  { %v575_v41 = vrot.slane %v574_v34, 2  ;;  %v588_v42 = vadd.f32 %v587_v35, %v585_v32  ;;  %v580_v44 = vadd.f32 %v579_v38, %v564_v33  ;;  %v593_v45 = vrot.slane %v586_v39, 4 }
 0x21b   :  { %v567_v46 = vpop.f32.mrf.mxu0 }
 0x21c   :  { %v576_v47 = vadd.f32 %v575_v41, %v574_v34  ;;  %v589_v49 = vrot.slane %v588_v42, 2  ;;  %v581_v50 = vrot.slane %v580_v44, 2  ;;  %v594_v51 = vadd.f32 %v593_v45, %v586_v39 }
 0x21e   :  { %v577_v52 = vrot.slane %v576_v47, 1  ;;  %v590_v53 = vadd.f32 %v589_v49, %v588_v42  ;;  %v582_v54 = vadd.f32 %v581_v50, %v580_v44  ;;  %v595_v55 = vrot.slane %v594_v51, 2 }
 0x220   :  { %v578_v56 = vadd.f32 %v577_v52, %v576_v47  ;;  %v591_v57 = vrot.slane %v590_v53, 1  ;;  %v583_v58 = vrot.slane %v582_v54, 1  ;;  %v596_v59 = vadd.f32 %v595_v55, %v594_v51 }
 0x222   :  { %v592_v60 = vadd.f32 %v591_v57, %v590_v53  ;;  %v599_v61 = vmul.f32 %v578_v56, %v1476_v5  ;;  %v584_v62 = vadd.f32 %v583_v58, %v582_v54  ;;  %v597_v63 = vrot.slane %v596_v59, 1 }
 0x224   :  { %v601_v48 = vmul.f32 %v592_v60, %v1476_v5  ;;  %v603_v0 = vmul.f32 %v599_v61, %v599_v61  ;;  %v598_v43 = vadd.f32 %v597_v63, %v596_v59  ;;  %v600_v1 = vmul.f32 %v584_v62, %v1476_v5 }
 0x226   :  { %v605_v2 = vsub.f32 %v601_v48, %v603_v0  ;;  %v602_v3 = vmul.f32 %v598_v43, %v1476_v5  ;;  %v604_v4 = vmul.f32 %v600_v1, %v600_v1 }
 0x228   :  { %v607_v6 = vadd.f32 0.8, %v605_v2  ;;  %v606_v7 = vsub.f32 %v602_v3, %v604_v4 }
 0x22a   :  { %v608_v8 = vadd.f32 0.8, %v606_v7  ;;  %1246 = vrsqrt.f32 %v607_v6 }
 0x22c   :  { %1248 = vrsqrt.f32 %v608_v8 }
 0x237   :  { %v1247_v9 = vpop.eup %1246 }
 0x239   :  { %v1249_v10 = vpop.eup %1248 }
 0x23a   :  { %v613_v11 = vcombine.low %v1247_v9, %v1249_v10 }
 0x23c   :  { %v620_v12 = vrot.slane %v613_v11, %v1482_v30 }
 0x23e   :  { %v627_v14 = vrot.slane %v620_v12, %v1482_v30 }
 0x240   :  { %v629_v15 = vmul.f32 %v627_v14, %v570_v13 }
 0x242   :  { %v634_v16 = vrot.slane %v629_v15, %v1486_v36  ;;  %v638_v17 = vrot.slane %v629_v15, %v1488_v37 }
 0x244   :  { %v641_v18 = vmul.f32 %v634_v16, %v599_v61  ;;  %v642_v19 = vmul.f32 %v638_v17, %v600_v1  ;;  %v663_v25 = vmul.f32 %v638_v17, %v564_v33  ;;  %v662_v27 = vmul.f32 %v634_v16, %v562_v29 }
 0x246   :  { %v645_v20 = vcombine.low %v641_v18, %v642_v19 }
 0x248   :  { %v652_v21 = vrot.slane %v645_v20, %v1482_v30 }
 0x24a   :  { %v659_v23 = vrot.slane %v652_v21, %v1482_v30  ;;  %v917_v21 = vld [vmem:[#allocation11 + $0x4] ss:$8 sm:$0x3] }
 0x24c   :  { %v661_v24 = vsub.f32 %v572_v22, %v659_v23 }
 0x24e   :  { %v672_v26 = vrot.slane %v661_v24, %v1488_v37  ;;  %v668_v28 = vrot.slane %v661_v24, %v1486_v36 }
 0x250   :  { %v676_v31 = vadd.f32 %v672_v26, %v663_v25  ;;  %v675_v32 = vadd.f32 %v668_v28, %v662_v27 }
 0x252   :  { %v678_v34 = vmul.f32 0.2, %v676_v31  ;;  %v677_v35 = vmul.f32 0.2, %v675_v32 }
 0x254   :  { %v680_v38 = vmax.f32 %v676_v31, %v678_v34  ;;  %v679_v39 = vmax.f32 %v675_v32, %v677_v35  ;;  %v919_v31 = vld [vmem:[#allocation11 + $0x5] ss:$8 sm:$0x3] }
 0x256   :  { %v682_v40 = vpack.c.bf16 %v680_v38, %v680_v38  ;;  %v681_v41 = vpack.c.bf16 %v679_v39, %v679_v39 }
 0x258   :  { %907 = vmatprep.mubr.bf16.mxu1 %v682_v40 }
 0x259   :  { %908 = vmatmul.mubr.bf16.vlgmr.msra.gmra.mxu1 %v681_v41  ;;  %v1029_v41 = vld [vmem:[#allocation11 + $0x6] ss:$8 sm:$0x3] }
 0x319   :  { %v909_v42 = vpop.f32.mrf.mxu1 }
 0x31a   :  { %v920_v44 = vrot.slane %v909_v42, 4  ;;  %v932_v45 = vmul.f32 %v909_v42, %v909_v42 }
 0x31b   :  { %v911_v46 = vpop.f32.mrf.mxu1 }
 0x31c   :  { %v921_v33 = vadd.f32 %v920_v44, %v909_v42  ;;  %v934_v47 = vrot.slane %v932_v45, 4  ;;  %v926_v49 = vrot.slane %v911_v46, 4  ;;  %v933_v29 = vmul.f32 %v911_v46, %v911_v46 }
 0x31d   :  { %v913_v50 = vpop.f32.mrf.mxu1 }
 0x31e   :  { %v922_v51 = vrot.slane %v921_v33, 2  ;;  %v935_v52 = vadd.f32 %v934_v47, %v932_v45  ;;  %v927_v53 = vadd.f32 %v926_v49, %v911_v46  ;;  %v940_v54 = vrot.slane %v933_v29, 4 }
 0x31f   :  { %v914_v55 = vpop.f32.mrf.mxu1  ;;  %v1034_v49 = vrot.slane %v1029_v41, %v1486_v36 }
 0x320   :  { %v923_v56 = vadd.f32 %v922_v51, %v921_v33  ;;  %v936_v57 = vrot.slane %v935_v52, 2  ;;  %v928_v58 = vrot.slane %v927_v53, 2  ;;  %v941_v59 = vadd.f32 %v940_v54, %v933_v29 }
 0x321   :  { %v1038_v29 = vrot.slane %v1029_v41, %v1488_v37 }
 0x322   :  { %v924_v60 = vrot.slane %v923_v56, 1  ;;  %v937_v61 = vadd.f32 %v936_v57, %v935_v52  ;;  %v929_v62 = vadd.f32 %v928_v58, %v927_v53  ;;  %v942_v63 = vrot.slane %v941_v59, 2 }
 0x324   :  { %v925_v48 = vadd.f32 %v924_v60, %v923_v56  ;;  %v938_v0 = vrot.slane %v937_v61, 1  ;;  %v930_v43 = vrot.slane %v929_v62, 1  ;;  %v943_v1 = vadd.f32 %v942_v63, %v941_v59 }
 0x326   :  { %v939_v2 = vadd.f32 %v938_v0, %v937_v61  ;;  %v946_v3 = vmul.f32 %v925_v48, %v1476_v5  ;;  %v931_v4 = vadd.f32 %v930_v43, %v929_v62  ;;  %v944_v6 = vrot.slane %v943_v1, 1 }
 0x328   :  { %v948_v7 = vmul.f32 %v939_v2, %v1476_v5  ;;  %v950_v8 = vmul.f32 %v946_v3, %v946_v3  ;;  %v945_v9 = vadd.f32 %v944_v6, %v943_v1  ;;  %v947_v10 = vmul.f32 %v931_v4, %v1476_v5 }
 0x32a   :  { %v952_v11 = vsub.f32 %v948_v7, %v950_v8  ;;  %v949_v12 = vmul.f32 %v945_v9, %v1476_v5  ;;  %v951_v13 = vmul.f32 %v947_v10, %v947_v10 }
 0x32c   :  { %v954_v14 = vadd.f32 0.8, %v952_v11  ;;  %v953_v15 = vsub.f32 %v949_v12, %v951_v13 }
 0x32e   :  { %v955_v16 = vadd.f32 0.8, %v953_v15  ;;  %1250 = vrsqrt.f32 %v954_v14 }
 0x330   :  { %1252 = vrsqrt.f32 %v955_v16 }
 0x33b   :  { %v1251_v17 = vpop.eup %1250 }
 0x33d   :  { %v1253_v18 = vpop.eup %1252 }
 0x33e   :  { %v960_v19 = vcombine.low %v1251_v17, %v1253_v18 }
 0x340   :  { %v967_v20 = vrot.slane %v960_v19, %v1482_v30 }
 0x342   :  { %v974_v22 = vrot.slane %v967_v20, %v1482_v30 }
 0x344   :  { %v976_v23 = vmul.f32 %v974_v22, %v917_v21 }
 0x346   :  { %v985_v24 = vrot.slane %v976_v23, %v1488_v37  ;;  %v981_v25 = vrot.slane %v976_v23, %v1486_v36 }
 0x348   :  { %v989_v5 = vmul.f32 %v985_v24, %v947_v10  ;;  %v988_v26 = vmul.f32 %v981_v25, %v946_v3  ;;  %v1010_v35 = vmul.f32 %v985_v24, %v911_v46  ;;  %v1009_v38 = vmul.f32 %v981_v25, %v909_v42 }
 0x34a   :  { %v992_v27 = vcombine.low %v988_v26, %v989_v5 }
 0x34c   :  { %v999_v28 = vrot.slane %v992_v27, %v1482_v30 }
 0x34e   :  { %v1006_v32 = vrot.slane %v999_v28, %v1482_v30 }
 0x350   :  { %v1008_v34 = vsub.f32 %v919_v31, %v1006_v32 }
 0x352   :  { %v1015_v39 = vrot.slane %v1008_v34, %v1486_v36  ;;  %v1019_v40 = vrot.slane %v1008_v34, %v1488_v37 }
 0x354   :  { %v1022_v44 = vadd.f32 %v1015_v39, %v1009_v38  ;;  %v1023_v45 = vadd.f32 %v1019_v40, %v1010_v35 }
 0x356   :  { %v1024_v33 = vmul.f32 0.2, %v1022_v44  ;;  %v1025_v47 = vmul.f32 0.2, %v1023_v45 }
 0x358   :  { %v1026_v50 = vmax.f32 %v1022_v44, %v1024_v33  ;;  %v1027_v51 = vmax.f32 %v1023_v45, %v1025_v47 }
 0x35a   :  { %v1041_v52 = vmul.f32 %v1034_v49, %v1026_v50  ;;  %v1042_v30 = vmul.f32 %v1038_v29, %v1027_v51 }
 0x35c   :  { %v1043_v53 = vadd.f32 %v1042_v30, %v1041_v52 }
 0x35e   :  { %1044 = vadd.xlane.f32.xlu0 %v1043_v53 }
 0x3e7   :  { %v1045_v42 = vpop.xlane.xlu0 %1044 }
 0x3e8   :  { %v1046_v46 = vmul.f32 0.5, %v1045_v42 }
 0x3ea   :  { %1254 = vtanh.f32 %v1046_v46 }
 0x3f7   :  { %v1255_v54 = vpop.eup %1254 }
 0x3f8   :  { %v1048_v55 = vadd.f32 1.0, %v1255_v54 }
 0x3fa   :  { %v1049_v56 = vmul.f32 0.5, %v1048_v55 }
 0x3fc   :  { %1051 = vst.msk [vmem:[%s1534_s7] sm:$0xff] %vm1050_vm1, %v1049_v56 }
 0x3fd   :  { %1056 = vsyncpa [#allocation4], 1 }
 0x3fe   :  { %1057 = vsyncpa [#allocation6], 1 }
 0x3ff   :  { %1058 = vsyncpa [#allocation9], 1 }
 0x400   :  { %1059 = vsyncpa [#allocation12], 1 }

</bundles_post_ra>
